<compile_context>
chip_gen: v6e
topology: v6e:2x2x1
jax: 0.10.0
libtpu: 0.0.40
codegen_flags: <defaults>
</compile_context>

<pallas_src>
import functools
import math
import numpy as np
import jax
import jax.numpy as jnp
from jax.experimental import pallas as pl
from jax.experimental.pallas import tpu as pltpu

LANE = 128   # lane-pad the transition dim so vector loads/stores are unmasked
SUB = 8      # sublane granularity for row padding


# ----------------------------- schedule / buffers (host, once) -----------------------------

def vp_beta_schedule(timesteps):
    t = np.arange(1, timesteps + 1, dtype=np.float64)
    T = timesteps
    b_max, b_min = 10.0, 0.1
    alpha = np.exp(-b_min / T - 0.5 * (b_max - b_min) * (2 * t - 1) / T ** 2)
    return 1.0 - alpha


def make_diffusion_buffers(n_timesteps):
    betas = vp_beta_schedule(n_timesteps)
    alphas = 1.0 - betas
    alphas_cumprod = np.cumprod(alphas)
    alphas_cumprod_prev = np.concatenate([np.ones(1), alphas_cumprod[:-1]])
    bufs = dict(
        betas=betas,
        sqrt_recip_alphas_cumprod=np.sqrt(1.0 / alphas_cumprod),
        sqrt_recipm1_alphas_cumprod=np.sqrt(1.0 / alphas_cumprod - 1.0),
        posterior_variance=betas * (1.0 - alphas_cumprod_prev) / (1.0 - alphas_cumprod),
        posterior_mean_coef1=betas * np.sqrt(alphas_cumprod_prev) / (1.0 - alphas_cumprod),
        posterior_mean_coef2=(1.0 - alphas_cumprod_prev) * np.sqrt(alphas) / (1.0 - alphas_cumprod),
    )
    bufs["posterior_log_variance_clipped"] = np.log(
        np.clip(bufs["posterior_variance"], 1e-20, None)
    )
    return {k: np.asarray(v, dtype=np.float32) for k, v in bufs.items()}


# ----------------------------------- fused Pallas kernel -----------------------------------

def _fused_sample_kernel(coef_ref, x0_ref, w_ref, keep_ref, cval_ref, add_ref, o_ref, *, t_real):
    """One grid step = one reverse-diffusion step; o_ref holds the resident trajectory slab.

    coef_ref (SMEM, f32[n_timesteps, 2], time-reversed):
      [s, 0] = a_x   = posterior_mean_coef1[t]*sqrt_recip_alphas_cumprod[t] + posterior_mean_coef2[t]
      [s, 1] = a_lin = posterior_mean_coef1[t]*sqrt_recipm1_alphas_cumprod[t]
    add_ref (VMEM, f32[rows, 128], time slice s):
      noise_scale[t]*noise  -  a_lin[t]*cfg_combined_bias(t, batch(row))
    keep_ref / cval_ref implement apply_conditioning: x <- x*keep + cval.
    """
    s = pl.program_id(0)

    @pl.when(s == 0)
    def _():
        o_ref[...] = x0_ref[...]          # initial randn (conditioning already applied)

    x = o_ref[...]                        # (rows, 128) resident in VMEM across all steps
    w = w_ref[...]                        # (8, 128); only the first t_real rows/cols are nonzero

    # synthetic linear denoiser trunk on the VPU: unrolled broadcast-MAC over the real columns
    lin = x[:, 0:1] * w[0:1, :]
    for k in range(1, t_real):
        lin = lin + x[:, k:k + 1] * w[k:k + 1, :]

    a_x = coef_ref[s, 0]
    a_lin = coef_ref[s, 1]

    # fused predict_start_from_noise + q_posterior mean + posterior sampling
    x_new = a_x * x - a_lin * lin + add_ref[...]

    # apply_conditioning (in-kernel so x never leaves VMEM between steps)
    o_ref[...] = x_new * keep_ref[...] + cval_ref[...]


# -------------------------------- module-level wrapper --------------------------------

class GaussianDiffusionPallas:
    def __init__(self, horizon, observation_dim, action_dim, n_timesteps, param_key):
        self.horizon = int(horizon)
        self.observation_dim = int(observation_dim)
        self.action_dim = int(action_dim)
        self.transition_dim = self.observation_dim + self.action_dim
        self.n_timesteps = int(n_timesteps)
        self.guide_s = 0.6
        self.buffers = make_diffusion_buffers(self.n_timesteps)

        # ---- precompute time-reversed fused coefficient tables (grid step s <-> timestep t = n-1-s)
        bufs = self.buffers
        idx = np.arange(self.n_timesteps - 1, -1, -1)
        c0 = bufs["sqrt_recip_alphas_cumprod"][idx]
        c1 = bufs["sqrt_recipm1_alphas_cumprod"][idx]
        c2 = bufs["posterior_mean_coef1"][idx]
        c3 = bufs["posterior_mean_coef2"][idx]
        logvar = bufs["posterior_log_variance_clipped"][idx]
        a_x = c2 * c0 + c3
        a_lin = c2 * c1
        # default_sample_fn uses noise = 0.5*randn and std = exp(0.5*logvar), masked at t==0
        # (the extra 0.5 matches the reference module exactly).
        noise_scale = (idx != 0).astype(np.float32) * 0.5 * np.exp(0.5 * logvar)
        self.coef_tab = jnp.asarray(np.stack([a_x, a_lin], axis=1).astype(np.float32))   # (n, 2)
        self.a_lin_t = jnp.asarray(a_lin.astype(np.float32))                             # (n,)
        self.noise_scale_t = jnp.asarray(noise_scale.astype(np.float32))                 # (n,)
        self.t_norm = jnp.asarray((idx / float(self.n_timesteps)).astype(np.float32))    # (n,)

        # ---- deterministic synthetic-model parameters (lane/sublane padded once)
        T = self.transition_dim
        W = jax.random.normal(param_key, (T, T), dtype=jnp.float32) * 0.1
        w_rows = ((T + SUB - 1) // SUB) * SUB
        self.W_pad = jnp.zeros((w_rows, LANE), dtype=jnp.float32).at[:T, :T].set(W)
        self.w_task = jnp.float32(0.3)
        self.w_val = jnp.float32(0.2)
        self.w_t = jnp.float32(0.1)

        self._sample = jax.jit(self._sample_impl, static_argnames=("horizon",))

    # ------------------------------ jitted end-to-end sampler ------------------------------

    def _sample_impl(self, cond, task, value, guidance, key, *, horizon):
        B = cond[0].shape[0]
        H = horizon
        T = self.transition_dim
        n_t = self.n_timesteps
        BH = B * H
        BHp = ((BH + SUB - 1) // SUB) * SUB

        k0, kn = jax.random.split(key)

        # initial trajectory noise + apply_conditioning (as in the reference)
        x3 = jax.random.normal(k0, (B, H, T), dtype=jnp.float32)
        for t_idx, val in cond.items():
            x3 = x3.at[:, t_idx, self.action_dim:].set(val)
        x0 = jnp.pad(x3.reshape(BH, T), ((0, BHp - BH), (0, LANE - T)))

        # in-kernel conditioning: keep-mask (static) + conditioned values (traced)
        keep_np = np.ones((BHp, LANE), dtype=np.float32)
        cval = jnp.zeros((BHp, LANE), dtype=jnp.float32)
        for t_idx, val in cond.items():
            rows = np.arange(B) * H + t_idx
            keep_np[rows, self.action_dim:T] = 0.0
            cval = cval.at[jnp.asarray(rows), self.action_dim:T].set(val)
        keep = jnp.asarray(keep_np)

        # CFG collapsed analytically: eps = lin + bias_u + s*(bias_c - bias_u)
        # context_mask for the CFG-doubled second half is 1, so the task term is zero; kept for parity.
        mask = jnp.float32(1.0)
        bias_u = (1.0 - mask) * self.w_task * task[None, :] + self.w_t * self.t_norm[:, None]  # (n, B)
        bias_c = bias_u + self.w_val * value[None, :]
        bias = bias_u + guidance * (bias_c - bias_u)                                           # (n, B)
        bias_rows = jnp.pad(jnp.repeat(bias, H, axis=1), ((0, 0), (0, BHp - BH)))              # (n, BHp)

        # all per-step noise drawn at once; pre-scale and fold -a_lin*bias into one additive slab
        noise = jax.random.normal(kn, (n_t, BH, T), dtype=jnp.float32)
        noise = jnp.pad(noise, ((0, 0), (0, BHp - BH), (0, LANE - T)))
        add = (self.noise_scale_t[:, None, None] * noise
               - self.a_lin_t[:, None, None] * bias_rows[:, :, None])                          # (n, BHp, 128)

        kernel = functools.partial(_fused_sample_kernel, t_real=T)
        w_rows = self.W_pad.shape[0]
        grid_spec = pltpu.PrefetchScalarGridSpec(
            num_scalar_prefetch=1,                       # coef table -> SMEM
            grid=(n_t,),
            in_specs=[
                pl.BlockSpec((BHp, LANE), lambda s, c: (0, 0)),       # x0 (read on step 0 only)
                pl.BlockSpec((w_rows, LANE), lambda s, c: (0, 0)),    # W (resident)
                pl.BlockSpec((BHp, LANE), lambda s, c: (0, 0)),       # keep mask (resident)
                pl.BlockSpec((BHp, LANE), lambda s, c: (0, 0)),       # cond values (resident)
                pl.BlockSpec((None, BHp, LANE), lambda s, c: (s, 0, 0)),  # per-step additive slab
            ],
            out_specs=pl.BlockSpec((BHp, LANE), lambda s, c: (0, 0)),     # x resident across steps
        )
        out = pl.pallas_call(
            kernel,
            out_shape=jax.ShapeDtypeStruct((BHp, LANE), jnp.float32),
            grid_spec=grid_spec,
            compiler_params=pltpu.CompilerParams(dimension_semantics=("arbitrary",)),
        )(self.coef_tab, x0, self.W_pad, keep, cval, add)

        x_final = out[:BH, :T].reshape(B, H, T)

        # sort_by_values over an all-zeros values vector (matches reference default_sample_fn)
        values = jnp.zeros((B,), dtype=jnp.float32)
        inds = jnp.argsort(-values)
        return x_final[inds], values[inds]

    # ------------------------------------ public API ------------------------------------

    def conditional_sample(self, cond, task, value, guidance, key, horizon=None):
        self.guide_s = guidance
        horizon = horizon or self.horizon
        return self._sample(cond, task, value, jnp.float32(guidance), key, horizon=horizon)

    def forward(self, cond, task, value, guidance, key):
        # TODO(synk): return_chain / Progress logging and the unused noise_task_cond model call
        # of the reference have no effect on the returned sample and are not implemented.
        return self.conditional_sample(cond, task, value, guidance, key)


# --------------------------------------- main ---------------------------------------

if __name__ == "__main__":
    key = jax.random.PRNGKey(0)
    k_param, k_cond, k_task, k_val, k_sample = jax.random.split(key, 5)

    B, horizon, obs_dim, action_dim = 2, 8, 4, 2
    n_timesteps = 16

    diffusion = GaussianDiffusionPallas(horizon, obs_dim, action_dim, n_timesteps, k_param)

    cond = {0: jax.random.normal(k_cond, (B, obs_dim), dtype=jnp.float32)}
    task = jax.random.normal(k_task, (B,), dtype=jnp.float32)
    value = jax.random.normal(k_val, (B,), dtype=jnp.float32)

    trajectories, values = diffusion.forward(cond, task, value, guidance=1.2, key=k_sample)
    jax.block_until_ready(trajectories)
    assert trajectories.shape == (B, horizon, obs_dim + action_dim)
    assert bool(jnp.all(jnp.isfinite(trajectories)))
    print("KERNEL_OK")
</pallas_src>

<mosaic_0001>
module attributes {stable_mosaic.version = 11 : i64} {
  func.func @_fused_sample_kernel(%arg0: i32, %arg1: memref<16x2xf32, #tpu.memory_space<smem>>, %arg2: memref<16x128xf32, #tpu.memory_space<vmem>>, %arg3: memref<8x128xf32, #tpu.memory_space<vmem>>, %arg4: memref<16x128xf32, #tpu.memory_space<vmem>>, %arg5: memref<16x128xf32, #tpu.memory_space<vmem>>, %arg6: memref<1x16x128xf32, #tpu.memory_space<vmem>>, %arg7: memref<16x128xf32, #tpu.memory_space<vmem>>) attributes {dimension_semantics = [#tpu.dimension_semantics<arbitrary>], iteration_bounds = array<i64: 16>, scalar_prefetch = 1 : i64, scratch_operands = 0 : i64, tpu.core_type = #tpu.core_type<tc>, window_params = [{pipeline_mode = #tpu.pipeline_mode<synchronous>, transform_indices = @transform_0, window_bounds = array<i64: 16, 128>}, {pipeline_mode = #tpu.pipeline_mode<synchronous>, transform_indices = @transform_1, window_bounds = array<i64: 8, 128>}, {pipeline_mode = #tpu.pipeline_mode<synchronous>, transform_indices = @transform_2, window_bounds = array<i64: 16, 128>}, {pipeline_mode = #tpu.pipeline_mode<synchronous>, transform_indices = @transform_3, window_bounds = array<i64: 16, 128>}, {transform_indices = @transform_4, window_bounds = array<i64: 1, 16, 128>}, {pipeline_mode = #tpu.pipeline_mode<synchronous>, transform_indices = @transform_5, window_bounds = array<i64: 16, 128>}]} {
    %c0_i32 = arith.constant 0 : i32
    %0 = arith.cmpi eq, %arg0, %c0_i32 : i32
    %1 = arith.extui %0 : i1 to i32
    %c0_i32_0 = arith.constant 0 : i32
    %2 = arith.cmpi ne, %1, %c0_i32_0 : i32
    scf.if %2 {
      %c0_14 = arith.constant 0 : index
      %c0_15 = arith.constant 0 : index
      %57 = vector.load %arg2[%c0_14, %c0_15] : memref<16x128xf32, #tpu.memory_space<vmem>>, vector<16x128xf32>
      %c0_16 = arith.constant 0 : index
      %c0_17 = arith.constant 0 : index
      %58 = vector.load %arg7[%c0_16, %c0_17] : memref<16x128xf32, #tpu.memory_space<vmem>>, vector<16x128xf32>
      tpu.vector_store %arg7[%c0_16, %c0_17], %57 {strides = array<i32>} : memref<16x128xf32, #tpu.memory_space<vmem>>, vector<16x128xf32>,
    } else {
    }
    %c0 = arith.constant 0 : index
    %c0_1 = arith.constant 0 : index
    %3 = vector.load %arg7[%c0, %c0_1] : memref<16x128xf32, #tpu.memory_space<vmem>>, vector<16x128xf32>
    %c0_2 = arith.constant 0 : index
    %c0_3 = arith.constant 0 : index
    %4 = vector.load %arg3[%c0_2, %c0_3] : memref<8x128xf32, #tpu.memory_space<vmem>>, vector<8x128xf32>
    %5 = vector.extract_strided_slice %3 {offsets = [0, 0], sizes = [16, 1], strides = [1, 1]} : vector<16x128xf32> to vector<16x1xf32>
    %6 = vector.extract_strided_slice %4 {offsets = [0, 0], sizes = [1, 128], strides = [1, 1]} : vector<8x128xf32> to vector<1x128xf32>
    %7 = vector.broadcast %5 : vector<16x1xf32> to vector<16x128xf32>
    %8 = vector.broadcast %6 : vector<1x128xf32> to vector<16x128xf32>
    %9 = arith.mulf %7, %8 : vector<16x128xf32>
    %10 = vector.extract_strided_slice %3 {offsets = [0, 1], sizes = [16, 1], strides = [1, 1]} : vector<16x128xf32> to vector<16x1xf32>
    %11 = vector.extract_strided_slice %4 {offsets = [1, 0], sizes = [1, 128], strides = [1, 1]} : vector<8x128xf32> to vector<1x128xf32>
    %12 = vector.broadcast %10 : vector<16x1xf32> to vector<16x128xf32>
    %13 = vector.broadcast %11 : vector<1x128xf32> to vector<16x128xf32>
    %14 = arith.mulf %12, %13 : vector<16x128xf32>
    %15 = arith.addf %9, %14 : vector<16x128xf32>
    %16 = vector.extract_strided_slice %3 {offsets = [0, 2], sizes = [16, 1], strides = [1, 1]} : vector<16x128xf32> to vector<16x1xf32>
    %17 = vector.extract_strided_slice %4 {offsets = [2, 0], sizes = [1, 128], strides = [1, 1]} : vector<8x128xf32> to vector<1x128xf32>
    %18 = vector.broadcast %16 : vector<16x1xf32> to vector<16x128xf32>
    %19 = vector.broadcast %17 : vector<1x128xf32> to vector<16x128xf32>
    %20 = arith.mulf %18, %19 : vector<16x128xf32>
    %21 = arith.addf %15, %20 : vector<16x128xf32>
    %22 = vector.extract_strided_slice %3 {offsets = [0, 3], sizes = [16, 1], strides = [1, 1]} : vector<16x128xf32> to vector<16x1xf32>
    %23 = vector.extract_strided_slice %4 {offsets = [3, 0], sizes = [1, 128], strides = [1, 1]} : vector<8x128xf32> to vector<1x128xf32>
    %24 = vector.broadcast %22 : vector<16x1xf32> to vector<16x128xf32>
    %25 = vector.broadcast %23 : vector<1x128xf32> to vector<16x128xf32>
    %26 = arith.mulf %24, %25 : vector<16x128xf32>
    %27 = arith.addf %21, %26 : vector<16x128xf32>
    %28 = vector.extract_strided_slice %3 {offsets = [0, 4], sizes = [16, 1], strides = [1, 1]} : vector<16x128xf32> to vector<16x1xf32>
    %29 = vector.extract_strided_slice %4 {offsets = [4, 0], sizes = [1, 128], strides = [1, 1]} : vector<8x128xf32> to vector<1x128xf32>
    %30 = vector.broadcast %28 : vector<16x1xf32> to vector<16x128xf32>
    %31 = vector.broadcast %29 : vector<1x128xf32> to vector<16x128xf32>
    %32 = arith.mulf %30, %31 : vector<16x128xf32>
    %33 = arith.addf %27, %32 : vector<16x128xf32>
    %34 = vector.extract_strided_slice %3 {offsets = [0, 5], sizes = [16, 1], strides = [1, 1]} : vector<16x128xf32> to vector<16x1xf32>
    %35 = vector.extract_strided_slice %4 {offsets = [5, 0], sizes = [1, 128], strides = [1, 1]} : vector<8x128xf32> to vector<1x128xf32>
    %36 = vector.broadcast %34 : vector<16x1xf32> to vector<16x128xf32>
    %37 = vector.broadcast %35 : vector<1x128xf32> to vector<16x128xf32>
    %38 = arith.mulf %36, %37 : vector<16x128xf32>
    %39 = arith.addf %33, %38 : vector<16x128xf32>
    %40 = arith.index_cast %arg0 : i32 to index
    %c0_4 = arith.constant 0 : index
    %41 = memref.load %arg1[%40, %c0_4] : memref<16x2xf32, #tpu.memory_space<smem>>
    %42 = arith.index_cast %arg0 : i32 to index
    %c1 = arith.constant 1 : index
    %43 = memref.load %arg1[%42, %c1] : memref<16x2xf32, #tpu.memory_space<smem>>
    %44 = vector.broadcast %41 : f32 to vector<16x128xf32>
    %45 = arith.mulf %44, %3 : vector<16x128xf32>
    %46 = vector.broadcast %43 : f32 to vector<16x128xf32>
    %47 = arith.mulf %46, %39 : vector<16x128xf32>
    %48 = arith.subf %45, %47 : vector<16x128xf32>
    %c0_5 = arith.constant 0 : index
    %c0_6 = arith.constant 0 : index
    %c0_7 = arith.constant 0 : index
    %49 = vector.load %arg6[%c0_5, %c0_6, %c0_7] : memref<1x16x128xf32, #tpu.memory_space<vmem>>, vector<1x16x128xf32>
    %50 = vector.shape_cast %49 : vector<1x16x128xf32> to vector<16x128xf32>
    %51 = arith.addf %48, %50 : vector<16x128xf32>
    %c0_8 = arith.constant 0 : index
    %c0_9 = arith.constant 0 : index
    %52 = vector.load %arg4[%c0_8, %c0_9] : memref<16x128xf32, #tpu.memory_space<vmem>>, vector<16x128xf32>
    %53 = arith.mulf %51, %52 : vector<16x128xf32>
    %c0_10 = arith.constant 0 : index
    %c0_11 = arith.constant 0 : index
    %54 = vector.load %arg5[%c0_10, %c0_11] : memref<16x128xf32, #tpu.memory_space<vmem>>, vector<16x128xf32>
    %55 = arith.addf %53, %54 : vector<16x128xf32>
    %c0_12 = arith.constant 0 : index
    %c0_13 = arith.constant 0 : index
    %56 = vector.load %arg7[%c0_12, %c0_13] : memref<16x128xf32, #tpu.memory_space<vmem>>, vector<16x128xf32>
    tpu.vector_store %arg7[%c0_12, %c0_13], %55 {strides = array<i32>} : memref<16x128xf32, #tpu.memory_space<vmem>>, vector<16x128xf32>,
    return
  }
  func.func @transform_0(%arg0: i32, %arg1: memref<16x2xf32, #tpu.memory_space<smem>>) -> (i32, i32) {
    %c0_i32 = arith.constant 0 : i32
    %c0_i32_0 = arith.constant 0 : i32
    %c0_i32_1 = arith.constant 0 : i32
    return %c0_i32, %c0_i32_0 : i32, i32
  }
  func.func @transform_1(%arg0: i32, %arg1: memref<16x2xf32, #tpu.memory_space<smem>>) -> (i32, i32) {
    %c0_i32 = arith.constant 0 : i32
    %c0_i32_0 = arith.constant 0 : i32
    %c0_i32_1 = arith.constant 0 : i32
    return %c0_i32, %c0_i32_0 : i32, i32
  }
  func.func @transform_2(%arg0: i32, %arg1: memref<16x2xf32, #tpu.memory_space<smem>>) -> (i32, i32) {
    %c0_i32 = arith.constant 0 : i32
    %c0_i32_0 = arith.constant 0 : i32
    %c0_i32_1 = arith.constant 0 : i32
    return %c0_i32, %c0_i32_0 : i32, i32
  }
  func.func @transform_3(%arg0: i32, %arg1: memref<16x2xf32, #tpu.memory_space<smem>>) -> (i32, i32) {
    %c0_i32 = arith.constant 0 : i32
    %c0_i32_0 = arith.constant 0 : i32
    %c0_i32_1 = arith.constant 0 : i32
    return %c0_i32, %c0_i32_0 : i32, i32
  }
  func.func @transform_4(%arg0: i32, %arg1: memref<16x2xf32, #tpu.memory_space<smem>>) -> (i32, i32, i32) {
    %c0_i32 = arith.constant 0 : i32
    %c0_i32_0 = arith.constant 0 : i32
    %c0_i32_1 = arith.constant 0 : i32
    return %arg0, %c0_i32, %c0_i32_0 : i32, i32, i32
  }
  func.func @transform_5(%arg0: i32, %arg1: memref<16x2xf32, #tpu.memory_space<smem>>) -> (i32, i32) {
    %c0_i32 = arith.constant 0 : i32
    %c0_i32_0 = arith.constant 0 : i32
    %c0_i32_1 = arith.constant 0 : i32
    return %c0_i32, %c0_i32_0 : i32, i32
  }
}

</mosaic_0001>

<bundles_post_ra>
// kernel: _sample_impl.1
= control target key start
LH: loop header
LB: loop body
LE: loop exit
PB: predicated region body
PF: predicated region fallthrough
CT: control target
= control target key end

     0   :  { %s567_s0 = inlined_call_operand.vmem [shape: f32[16,2], index: 0, kind: input, shape index: {}]   ;;  %s568_s1 = inlined_call_operand.vmem [shape: f32[16,128], index: 1, kind: input, shape index: {}]   ;;  %s569_s2 = inlined_call_operand.vmem [shape: f32[8,128], index: 2, kind: input, shape index: {}]   ;;  %s570_s3 = inlined_call_operand.vmem [shape: f32[16,128], index: 3, kind: input, shape index: {}]   ;;  %s571_s4 = inlined_call_operand.vmem [shape: f32[16,128], index: 4, kind: input, shape index: {}]   ;;  %s572_s5 = inlined_call_operand.vmem [shape: f32[16,16,128], index: 5, kind: input, shape index: {}]   ;;  %s573_s6 = inlined_call_operand.vmem [shape: f32[16,128], index: 6, kind: output, shape index: {}]  }
   0x1   :  { %s11_s23 = sshll.u32 %s567_s0, 4  ;;  %s12_s23 = int_to_ptr.vmem [resolvable:$true] %s11_s23 }
   0x2   :  { %s413_s24 = scalar_lea.vmem %s12_s23, 256  ;;  %p418_p1 = scmp.lt.s32.totalorder %s12_s23, %s12_s23 }
   0x3   :  { %p414_p0 = scmp.ne.s32.totalorder %s12_s23, %s413_s24  ;;  %p419_p2 = scmp.lt.s32.totalorder %s413_s24, %s413_s24 }
   0x5   :  { %p420_p3 = por %p419_p2, %p418_p1 }
   0x7   :  { %p421_p4 = pnand %p420_p3, %p414_p0 }
   0x9   :  { %424 = shalt.err (!%p421_p4)  }
   0xa   :  { %s435_s25 = smov [#allocation3]  }
   0xb   :  { %14 = dma.vmem_to_smem %s12_s23, 256, %s435_s25, [#allocation2] }
   0xc   :  { %429 = dma.done.wait [#allocation2], 256 }
   0xd   :  { %430 = vsyncadd [#allocation2], 4294967040 }
   0xe   :  { %16 = sfence }
   0xf   :  { %s480_s26 = smov 0  }
  0x10 LB: > { %s486_s0 = sadd.s32 4294967295, %s433_s26   ;;  %p381_p5 = scmp.ge.s32.totalorder %s433_s26, 1  ;;  %s433_s26 = sphi %s480_s26, %s22_s26  }
  0x11   : > { %p189_p6 = scmp.lt.s32.totalorder %s433_s26, 17 }
  0x13   : > { %p190_p7 = pnand %p381_p5, %p189_p6 }
  0x14   : > { %p212_p8 = scmp.lt.s32.totalorder (!%p190_p7), %s486_s0, 15  ;;  %p384_p9 = scmp.ne.s32.totalorder (!%p190_p7), %s486_s0, 0 }
  0x15   : > { %193 = sbr.rel (%p190_p7) target bundleno = 208 (0xd0), region = 40 }
  0x1a   : > { %s213_s27 = scalar_select %p212_p8, %s486_s0, 15 }
  0x1b   : > { %220 = sbr.rel (%p384_p9) target bundleno = 34 (0x22), region = 44 }
  0x1c   : > { %s388_s28 = sshll.u32 %s213_s27, 4 }
  0x1d   : > { %s495_s7 = scalar_lea.vmem %s572_s5, %s388_s28 }
  0x20   : > { %v221_v0 = vld [vmem:[%s568_s1] sm:$0xff]  ;;  %v222_v1 = vld [vmem:[%s568_s1 + $0x8] sm:$0xff] }
  0x21   : > { %223 = vst [vmem:[%s573_s6] sm:$0xff] %v221_v0  ;;  %224 = vst [vmem:[%s573_s6 + $0x8] sm:$0xff] %v222_v1 }
  0x22 PF: > { %v436_v3 = vmov 1   ;;  %v437_v4 = vmov 0   ;;  %v438_v6 = vmov 2   ;;  %v439_v7 = vmov 3   ;;  %v227_v18 = vld [vmem:[%s569_s2] sm:$0xff]  ;;  %s385_s22 = sshll.u32 %s486_s0, 7 }
  0x23   : > { %405 = vset.pattern.permute.xlu1 %v436_v3  ;;  %404 = vset.pattern.permute.xlu0 %v437_v4  ;;  %v440_v8 = vmov 4   ;;  %v441_v9 = vmov 5   ;;  %v238_v10 = vlaneseq  ;;  %s326_s23 = sadd.s32 1, %s385_s22  ;;  %s536_s24 = sld [smem:[#allocation3 + %s385_s22]]  ;;  %v336_v59 = vld [vmem:[%s495_s7] sm:$0xff] }
  0x24   : > { %s538_s25 = sld [smem:[#allocation3 + %s326_s23]]  ;;  %v340_v62 = vld [vmem:[%s570_s3] sm:$0xff] }
  0x25   : > { %v239_v11 = vshrl.u32 %v238_v10, 7  ;;  %v344_v3 = vld [vmem:[%s571_s4] sm:$0xff] }
  0x27   : > { %v254_v14 = vsub.s32 1, %v239_v11  ;;  %v240_v15 = vsub.s32 0, %v239_v11  ;;  %v270_v19 = vsub.s32 2, %v239_v11  ;;  %v286_v20 = vsub.s32 3, %v239_v11 }
  0x28   : > { %v513_v2 = vld [vmem:[%s573_s6] sm:$0xff]  ;;  %v520_v5 = vld [vmem:[%s573_s6 + $0x8] sm:$0xff]  ;;  %v302_v29 = vsub.s32 4, %v239_v11  ;;  %v318_v30 = vsub.s32 5, %v239_v11 }
  0x29   : > { %245 = vperm.xlu1 %405, %v513_v2   ;;  %230 = vperm.xlu0 %404, %v513_v2   ;;  %v255_v21 = vrot.slane %v227_v18, %v254_v14  ;;  %v241_v22 = vrot.slane %v227_v18, %v240_v15  ;;  %v271_v25 = vrot.slane %v227_v18, %v270_v19  ;;  %v328_v47 = vstv %s536_s24  ;;  %v341_v11 = vld [vmem:[%s570_s3 + $0x8] sm:$0xff] }
  0x2a   : > { %v287_v26 = vrot.slane %v227_v18, %v286_v20  ;;  %v303_v36 = vrot.slane %v227_v18, %v302_v29  ;;  %v319_v37 = vrot.slane %v227_v18, %v318_v30  ;;  %v331_v51 = vstv %s538_s25 }
  0x2b   : > { %v329_v54 = vmul.f32 %v328_v47, %v513_v2 }
  0x2d   : > { %249 = vperm.xlu1 %405, %v520_v5   ;;  %235 = vperm.xlu0 %404, %v520_v5  }
  0x31   : > { %407 = vset.pattern.permute.xlu1 %v438_v6  ;;  %406 = vset.pattern.permute.xlu0 %v438_v6 }
  0x32   : > { %265 = vperm.xlu1 %407, %v520_v5   ;;  %261 = vperm.xlu0 %406, %v513_v2  }
  0x36   : > { %408 = vset.pattern.permute.xlu1 %v439_v7  ;;  %409 = vset.pattern.permute.xlu0 %v439_v7 }
  0x37   : > { %277 = vperm.xlu1 %408, %v513_v2   ;;  %281 = vperm.xlu0 %409, %v520_v5  }
  0x3b   : > { %410 = vset.pattern.permute.xlu1 %v440_v8  ;;  %411 = vset.pattern.permute.xlu0 %v441_v9 }
  0x3c   : > { %293 = vperm.xlu1 %410, %v513_v2   ;;  %309 = vperm.xlu0 %411, %v513_v2   ;;  %v330_v2 = vmul.f32 %v328_v47, %v520_v5 }
  0x40   : > { %297 = vperm.xlu1 %410, %v520_v5  }
  0x44   : > { %412 = vset.pattern.permute.xlu1 %v441_v9  ;;  %v337_v9 = vld [vmem:[%s495_s7 + $0x8] sm:$0xff] }
  0x45   : > { %313 = vperm.xlu1 %412, %v520_v5  }
  0xa4   : > { %v246_v12 = vpop.permute.xlu1 %245  ;;  %v231_v13 = vpop.permute.xlu0 %230 }
  0xa5   : > { %v256_v27 = vmul.f32 %v255_v21, %v246_v12  ;;  %v242_v28 = vmul.f32 %v241_v22, %v231_v13  ;;  %v345_v13 = vld [vmem:[%s571_s4 + $0x8] sm:$0xff] }
  0xa7   : > { %v258_v34 = vadd.f32 %v256_v27, %v242_v28 }
  0xa8   : > { %v250_v16 = vpop.permute.xlu1 %249  ;;  %v236_v17 = vpop.permute.xlu0 %235 }
  0xa9   : > { %v257_v39 = vmul.f32 %v255_v21, %v250_v16  ;;  %v243_v40 = vmul.f32 %v241_v22, %v236_v17 }
  0xab   : > { %v259_v49 = vadd.f32 %v257_v39, %v243_v40 }
  0xad   : > { %v266_v23 = vpop.permute.xlu1 %265  ;;  %v262_v24 = vpop.permute.xlu0 %261 }
  0xae   : > { %v272_v31 = vmul.f32 %v271_v25, %v262_v24  ;;  %v273_v46 = vmul.f32 %v271_v25, %v266_v23 }
  0xb0   : > { %v274_v38 = vadd.f32 %v272_v31, %v258_v34  ;;  %v275_v55 = vadd.f32 %v273_v46, %v259_v49 }
  0xb2   : > { %v278_v32 = vpop.permute.xlu1 %277  ;;  %v282_v33 = vpop.permute.xlu0 %281 }
  0xb3   : > { %v288_v35 = vmul.f32 %v287_v26, %v278_v32  ;;  %v289_v50 = vmul.f32 %v287_v26, %v282_v33 }
  0xb5   : > { %v290_v43 = vadd.f32 %v288_v35, %v274_v38  ;;  %v291_v58 = vadd.f32 %v289_v50, %v275_v55 }
  0xb7   : > { %v294_v41 = vpop.permute.xlu1 %293  ;;  %v310_v42 = vpop.permute.xlu0 %309 }
  0xb8   : > { %v304_v44 = vmul.f32 %v303_v36, %v294_v41  ;;  %v320_v45 = vmul.f32 %v319_v37, %v310_v42 }
  0xba   : > { %v306_v48 = vadd.f32 %v304_v44, %v290_v43 }
  0xbb   : > { %v298_v52 = vpop.permute.xlu1 %297 }
  0xbc   : > { %v322_v53 = vadd.f32 %v320_v45, %v306_v48  ;;  %v305_v56 = vmul.f32 %v303_v36, %v298_v52 }
  0xbe   : > { %v332_v57 = vmul.f32 %v331_v51, %v322_v53  ;;  %v307_v63 = vadd.f32 %v305_v56, %v291_v58 }
  0xc0   : > { %v334_v60 = vsub.f32 %v329_v54, %v332_v57  ;;  %v314_v61 = vpop.permute.xlu1 %313 }
  0xc1   : > { %v321_v0 = vmul.f32 %v319_v37, %v314_v61 }
  0xc2   : > { %v338_v1 = vadd.f32 %v336_v59, %v334_v60 }
  0xc3   : > { %v323_v4 = vadd.f32 %v321_v0, %v307_v63 }
  0xc4   : > { %v342_v6 = vmul.f32 %v340_v62, %v338_v1 }
  0xc5   : > { %v333_v7 = vmul.f32 %v331_v51, %v323_v4 }
  0xc6   : > { %v346_v8 = vadd.f32 %v344_v3, %v342_v6 }
  0xc7   : > { %v335_v10 = vsub.f32 %v330_v2, %v333_v7 }
  0xc8   : > { %348 = vst [vmem:[%s573_s6] sm:$0xff] %v346_v8 }
  0xc9   : > { %v339_v12 = vadd.f32 %v337_v9, %v335_v10 }
  0xcb   : > { %v343_v5 = vmul.f32 %v341_v11, %v339_v12 }
  0xcd   : > { %v347_v14 = vadd.f32 %v345_v13, %v343_v5 }
  0xcf   : > { %349 = vst [vmem:[%s573_s6 + $0x8] sm:$0xff] %v347_v14 }
  0xd0 PF: > { %s22_s26 = sadd.s32 1, %s433_s26  }
  0xd1   : > { %p19_p10 = scmp.ge.s32.totalorder %s22_s26, 18  }
  0xd3   :  { %21 = sbr.rel (!%p19_p10) target bundleno = 16 (0x10), region = 70 }

</bundles_post_ra>
